<compile_context>
chip_gen: v7x
topology: tpu7x:2x2x1
jax: 0.10.0
libtpu: 0.0.40
codegen_flags: <defaults>
</compile_context>

<pallas_src>
import jax
import jax.numpy as jnp
from jax import lax
from jax.experimental import pallas as pl
from jax.experimental.pallas import tpu as pltpu

_HIDDEN = 128
_TILE_B = 512  # batch tile; well under VMEM limits on v5e/v6e/v7x


def _mlp_kernel(x_ref, w1_ref, b1_ref, w2_ref, b2_ref, w3t_ref, b3_ref, o_ref):
    """One batch tile of sigmoid(relu(relu(x@W1+b1)@W2+b2)@W3+b3).

    x_ref  : (TB, F)    bf16  streamed per grid step
    w1_ref : (F, 128)   bf16  VMEM-resident (constant index_map)
    w2_ref : (128, 128) bf16  VMEM-resident
    w3t_ref: (1, 128)   f32   W3 transposed (lane-dense head)
    b*_ref : f32 biases
    o_ref  : (1, TB)    f32   lane-dense output row
    """
    x = x_ref[...]

    # Layer 1: MXU, bf16 operands, f32 accumulation.
    h1 = jnp.dot(x, w1_ref[...], preferred_element_type=jnp.float32) + b1_ref[...]
    h1 = jnp.maximum(h1, 0.0)

    # Layer 2: MXU, bf16 operands, f32 accumulation.
    h2 = jnp.dot(h1.astype(jnp.bfloat16), w2_ref[...],
                 preferred_element_type=jnp.float32) + b2_ref[...]
    h2 = jnp.maximum(h2, 0.0)                     # (TB, 128) f32

    # Layer 3 head: (1,128) x (TB,128)^T -> (1, TB). Contracting the last dim
    # of both operands (the flash-attention q@k^T form) yields the result
    # already lane-dense, so the HBM writeback is an unmasked full-lane store
    # instead of the 1-of-128-lane masked store a (TB, 1) output would force.
    logits = lax.dot_general(w3t_ref[...], h2, (((1,), (1,)), ((), ())),
                             preferred_element_type=jnp.float32) + b3_ref[...]

    # Sigmoid runs on the EUP slot (idle during the matmuls) -> effectively free.
    o_ref[...] = jax.nn.sigmoid(logits).astype(o_ref.dtype)


@jax.jit
def my_model_forward(x, w1, b1, w2, b2, w3, b3):
    """x: (B, F) float array. Returns (B, 1) float32 probabilities."""
    B, F = x.shape
    tb = B if B <= _TILE_B else _TILE_B          # single tile for small batches
    grid = (pl.cdiv(B, tb),)

    # bf16 MXU operands (accumulation stays f32 inside the kernel).
    xb = x.astype(jnp.bfloat16)
    w1b = w1.astype(jnp.bfloat16)
    w2b = w2.astype(jnp.bfloat16)
    w3t = w3.reshape(1, _HIDDEN)                 # (128, 1) -> (1, 128)

    out_row = pl.pallas_call(
        _mlp_kernel,
        out_shape=jax.ShapeDtypeStruct((1, B), jnp.float32),
        grid=grid,
        in_specs=[
            # x: one (tb, F) tile per grid step (auto double-buffered).
            pl.BlockSpec((tb, F), lambda i: (i, 0)),
            # Weights / biases: constant index_map -> fetched once, VMEM-pinned.
            pl.BlockSpec((F, _HIDDEN), lambda i: (0, 0)),
            pl.BlockSpec((1, _HIDDEN), lambda i: (0, 0)),
            pl.BlockSpec((_HIDDEN, _HIDDEN), lambda i: (0, 0)),
            pl.BlockSpec((1, _HIDDEN), lambda i: (0, 0)),
            pl.BlockSpec((1, _HIDDEN), lambda i: (0, 0)),
            pl.BlockSpec((1, 1), lambda i: (0, 0)),
        ],
        # Lane-dense (1, tb) output row per tile; reshaped to (B, 1) below.
        out_specs=pl.BlockSpec((1, tb), lambda i: (0, i)),
        compiler_params=pltpu.CompilerParams(
            # Batch tiles are independent -> shard across TCs on v7x megacore.
            dimension_semantics=("parallel",),
        ),
    )(xb, w1b, b1, w2b, b2, w3t, b3)
    return out_row.reshape(B, 1)


def init_params(key, number_of_features, hidden=_HIDDEN):
    """PyTorch nn.Linear default init: U(-1/sqrt(fan_in), +1/sqrt(fan_in))."""
    k1, k2, k3, k4, k5, k6 = jax.random.split(key, 6)

    def lin(kw, kb, fan_in, fan_out):
        bound = 1.0 / jnp.sqrt(fan_in)
        w = jax.random.uniform(kw, (fan_in, fan_out), jnp.float32, -bound, bound)
        b = jax.random.uniform(kb, (1, fan_out), jnp.float32, -bound, bound)
        return w, b

    w1, b1 = lin(k1, k2, number_of_features, hidden)
    w2, b2 = lin(k3, k4, hidden, hidden)
    w3, b3 = lin(k5, k6, hidden, 1)
    return w1, b1, w2, b2, w3, b3


def reference_forward_f32(x, w1, b1, w2, b2, w3, b3):
    """Pure-f32 reference (original module semantics)."""
    h1 = jnp.maximum(x @ w1 + b1, 0.0)
    h2 = jnp.maximum(h1 @ w2 + b2, 0.0)
    return jax.nn.sigmoid(h2 @ w3 + b3)


def reference_forward_bf16(x, w1, b1, w2, b2, w3, b3):
    """Reference that mirrors the kernel's bf16-operand / f32-accumulation math."""
    xb = x.astype(jnp.bfloat16)
    w1b = w1.astype(jnp.bfloat16)
    w2b = w2.astype(jnp.bfloat16)
    h1 = jnp.maximum(
        jnp.dot(xb, w1b, preferred_element_type=jnp.float32) + b1, 0.0)
    h2 = jnp.maximum(
        jnp.dot(h1.astype(jnp.bfloat16), w2b,
                preferred_element_type=jnp.float32) + b2, 0.0)
    return jax.nn.sigmoid(jnp.dot(h2, w3, preferred_element_type=jnp.float32) + b3)


if __name__ == "__main__":
    key = jax.random.PRNGKey(0)
    kx, kp = jax.random.split(key)

    # Small problem overall (~128 KB of activations), but batch=1024 exercises
    # the 2-step tiled grid (TILE_B=512) rather than a degenerate single block.
    batch, number_of_features = 1024, 32
    x = jax.random.normal(kx, (batch, number_of_features), jnp.float32)
    params = init_params(kp, number_of_features)

    out = jax.block_until_ready(my_model_forward(x, *params))

    ref_bf16 = reference_forward_bf16(x, *params)
    ref_f32 = reference_forward_f32(x, *params)

    assert out.shape == (batch, 1), out.shape
    assert bool(jnp.all(jnp.isfinite(out))), "non-finite output"
    assert jnp.allclose(out, ref_bf16, atol=2e-3, rtol=0), \
        "mismatch vs bf16-matched reference"
    assert jnp.allclose(out, ref_f32, atol=5e-3, rtol=0), \
        "mismatch vs f32 reference"

    print("KERNEL_OK")
</pallas_src>

<mosaic_0001>
module attributes {stable_mosaic.version = 11 : i64} {
  func.func @_mlp_kernel(%arg0: i32, %arg1: memref<512x32xbf16, #tpu.memory_space<vmem>>, %arg2: memref<32x128xbf16, #tpu.memory_space<vmem>>, %arg3: memref<1x128xf32, #tpu.memory_space<vmem>>, %arg4: memref<128x128xbf16, #tpu.memory_space<vmem>>, %arg5: memref<1x128xf32, #tpu.memory_space<vmem>>, %arg6: memref<1x128xf32, #tpu.memory_space<vmem>>, %arg7: memref<1x1xf32, #tpu.memory_space<vmem>>, %arg8: memref<1x512xf32, #tpu.memory_space<vmem>>) attributes {dimension_semantics = [#tpu.dimension_semantics<parallel>], iteration_bounds = array<i64: 2>, scalar_prefetch = 0 : i64, scratch_operands = 0 : i64, tpu.core_type = #tpu.core_type<tc>, window_params = [{transform_indices = @transform_0, window_bounds = array<i64: 512, 32>}, {pipeline_mode = #tpu.pipeline_mode<synchronous>, transform_indices = @transform_1, window_bounds = array<i64: 32, 128>}, {pipeline_mode = #tpu.pipeline_mode<synchronous>, transform_indices = @transform_2, window_bounds = array<i64: 1, 128>}, {pipeline_mode = #tpu.pipeline_mode<synchronous>, transform_indices = @transform_3, window_bounds = array<i64: 128, 128>}, {pipeline_mode = #tpu.pipeline_mode<synchronous>, transform_indices = @transform_4, window_bounds = array<i64: 1, 128>}, {pipeline_mode = #tpu.pipeline_mode<synchronous>, transform_indices = @transform_5, window_bounds = array<i64: 1, 128>}, {pipeline_mode = #tpu.pipeline_mode<synchronous>, transform_indices = @transform_6, window_bounds = array<i64: 1, 1>}, {transform_indices = @transform_7, window_bounds = array<i64: 1, 512>}]} {
    %c0 = arith.constant 0 : index
    %c0_0 = arith.constant 0 : index
    %0 = vector.load %arg1[%c0, %c0_0] : memref<512x32xbf16, #tpu.memory_space<vmem>>, vector<512x32xbf16>
    %c0_1 = arith.constant 0 : index
    %c0_2 = arith.constant 0 : index
    %1 = vector.load %arg2[%c0_1, %c0_2] : memref<32x128xbf16, #tpu.memory_space<vmem>>, vector<32x128xbf16>
    %cst = arith.constant dense<0.000000e+00> : vector<512x128xf32>
    %2 = tpu.matmul %0, %1, %cst {dimension_numbers = #tpu.dot_dimension_numbers<[1], [0], [0], [1], [0, 0, 1, 1], [], []>} : vector<512x32xbf16>, vector<32x128xbf16>, vector<512x128xf32> -> vector<512x128xf32>
    %c0_3 = arith.constant 0 : index
    %c0_4 = arith.constant 0 : index
    %3 = vector.load %arg3[%c0_3, %c0_4] : memref<1x128xf32, #tpu.memory_space<vmem>>, vector<1x128xf32>
    %4 = vector.broadcast %3 : vector<1x128xf32> to vector<512x128xf32>
    %5 = arith.addf %2, %4 : vector<512x128xf32>
    %cst_5 = arith.constant 0.000000e+00 : f32
    %6 = vector.broadcast %cst_5 : f32 to vector<512x128xf32>
    %7 = arith.maximumf %5, %6 : vector<512x128xf32>
    %8 = arith.truncf %7 : vector<512x128xf32> to vector<512x128xbf16>
    %c0_6 = arith.constant 0 : index
    %c0_7 = arith.constant 0 : index
    %9 = vector.load %arg4[%c0_6, %c0_7] : memref<128x128xbf16, #tpu.memory_space<vmem>>, vector<128x128xbf16>
    %cst_8 = arith.constant dense<0.000000e+00> : vector<512x128xf32>
    %10 = tpu.matmul %8, %9, %cst_8 {dimension_numbers = #tpu.dot_dimension_numbers<[1], [0], [0], [1], [0, 0, 1, 1], [], []>} : vector<512x128xbf16>, vector<128x128xbf16>, vector<512x128xf32> -> vector<512x128xf32>
    %c0_9 = arith.constant 0 : index
    %c0_10 = arith.constant 0 : index
    %11 = vector.load %arg5[%c0_9, %c0_10] : memref<1x128xf32, #tpu.memory_space<vmem>>, vector<1x128xf32>
    %12 = vector.broadcast %11 : vector<1x128xf32> to vector<512x128xf32>
    %13 = arith.addf %10, %12 : vector<512x128xf32>
    %cst_11 = arith.constant 0.000000e+00 : f32
    %14 = vector.broadcast %cst_11 : f32 to vector<512x128xf32>
    %15 = arith.maximumf %13, %14 : vector<512x128xf32>
    %c0_12 = arith.constant 0 : index
    %c0_13 = arith.constant 0 : index
    %16 = vector.load %arg6[%c0_12, %c0_13] : memref<1x128xf32, #tpu.memory_space<vmem>>, vector<1x128xf32>
    %cst_14 = arith.constant dense<0.000000e+00> : vector<1x512xf32>
    %17 = tpu.matmul %16, %15, %cst_14 {dimension_numbers = #tpu.dot_dimension_numbers<[1], [1], [0], [0], [0, 0, 1, 0], [], []>} : vector<1x128xf32>, vector<512x128xf32>, vector<1x512xf32> -> vector<1x512xf32>
    %c0_15 = arith.constant 0 : index
    %c0_16 = arith.constant 0 : index
    %18 = vector.load %arg7[%c0_15, %c0_16] : memref<1x1xf32, #tpu.memory_space<vmem>>, vector<1x1xf32>
    %19 = vector.broadcast %18 : vector<1x1xf32> to vector<1x512xf32>
    %20 = arith.addf %17, %19 : vector<1x512xf32>
    %21 = arith.negf %20 : vector<1x512xf32>
    %22 = math.exp %21 : vector<1x512xf32>
    %cst_17 = arith.constant 1.000000e+00 : f32
    %23 = vector.broadcast %cst_17 : f32 to vector<1x512xf32>
    %24 = arith.addf %23, %22 : vector<1x512xf32>
    %25 = arith.divf %23, %24 : vector<1x512xf32>
    %c0_18 = arith.constant 0 : index
    %c0_19 = arith.constant 0 : index
    %26 = vector.load %arg8[%c0_18, %c0_19] : memref<1x512xf32, #tpu.memory_space<vmem>>, vector<1x512xf32>
    tpu.vector_store %arg8[%c0_18, %c0_19], %25 {strides = array<i32>} : memref<1x512xf32, #tpu.memory_space<vmem>>, vector<1x512xf32>,
    return
  }
  func.func @transform_0(%arg0: i32) -> (i32, i32) {
    %c0_i32 = arith.constant 0 : i32
    %c0_i32_0 = arith.constant 0 : i32
    return %arg0, %c0_i32 : i32, i32
  }
  func.func @transform_1(%arg0: i32) -> (i32, i32) {
    %c0_i32 = arith.constant 0 : i32
    %c0_i32_0 = arith.constant 0 : i32
    %c0_i32_1 = arith.constant 0 : i32
    return %c0_i32, %c0_i32_0 : i32, i32
  }
  func.func @transform_2(%arg0: i32) -> (i32, i32) {
    %c0_i32 = arith.constant 0 : i32
    %c0_i32_0 = arith.constant 0 : i32
    %c0_i32_1 = arith.constant 0 : i32
    return %c0_i32, %c0_i32_0 : i32, i32
  }
  func.func @transform_3(%arg0: i32) -> (i32, i32) {
    %c0_i32 = arith.constant 0 : i32
    %c0_i32_0 = arith.constant 0 : i32
    %c0_i32_1 = arith.constant 0 : i32
    return %c0_i32, %c0_i32_0 : i32, i32
  }
  func.func @transform_4(%arg0: i32) -> (i32, i32) {
    %c0_i32 = arith.constant 0 : i32
    %c0_i32_0 = arith.constant 0 : i32
    %c0_i32_1 = arith.constant 0 : i32
    return %c0_i32, %c0_i32_0 : i32, i32
  }
  func.func @transform_5(%arg0: i32) -> (i32, i32) {
    %c0_i32 = arith.constant 0 : i32
    %c0_i32_0 = arith.constant 0 : i32
    %c0_i32_1 = arith.constant 0 : i32
    return %c0_i32, %c0_i32_0 : i32, i32
  }
  func.func @transform_6(%arg0: i32) -> (i32, i32) {
    %c0_i32 = arith.constant 0 : i32
    %c0_i32_0 = arith.constant 0 : i32
    %c0_i32_1 = arith.constant 0 : i32
    return %c0_i32, %c0_i32_0 : i32, i32
  }
  func.func @transform_7(%arg0: i32) -> (i32, i32) {
    %c0_i32 = arith.constant 0 : i32
    %c0_i32_0 = arith.constant 0 : i32
    return %c0_i32, %arg0 : i32, i32
  }
}

</mosaic_0001>

<bundles_post_ra>
// kernel: my_model_forward.1
= control target key start
LH: loop header
LB: loop body
LE: loop exit
PB: predicated region body
PF: predicated region fallthrough
CT: control target
= control target key end

     0   :  { %s2768_s0 = inlined_call_operand.vmem [shape: bf16[1024,32], index: 0, kind: input, shape index: {}]   ;;  %s2769_s1 = inlined_call_operand.vmem [shape: bf16[32,128], index: 1, kind: input, shape index: {}]   ;;  %s2770_s2 = inlined_call_operand.vmem [shape: f32[1,128], index: 2, kind: input, shape index: {}]   ;;  %s2771_s3 = inlined_call_operand.vmem [shape: bf16[128,128], index: 3, kind: input, shape index: {}]   ;;  %s2772_s4 = inlined_call_operand.vmem [shape: f32[1,128], index: 4, kind: input, shape index: {}]   ;;  %s2773_s5 = inlined_call_operand.vmem [shape: f32[1,128], index: 5, kind: input, shape index: {}]   ;;  %s2774_s6 = inlined_call_operand.<no memory space> [shape: f32[1,1], index: 6, kind: input, shape index: {}]   ;;  %s2775_s7 = inlined_call_operand.hbm [shape: f32[1,1024], index: 7, kind: output, shape index: {}]  }
   0x1   :  { %v12_v0 = vstv %s2774_s6 }
   0x2   :  { %13 = vst [vmem:[#allocation2] sm:$0x1] %v12_v0 }
   0x3   :  { %14 = vsyncpa [#allocation4], 0 }
   0x4   :  { %16 = vsyncpa [#allocation4 + $0x1], 0  ;;  %s2378_s26 = smov 0   ;;  %s2380_s27 = smov 0  }
   0x5   :  { %s2382_s28 = smov 0   ;;  %s2384_s29 = smov 0  }
   0x6 LB: > { %s1720_s6 = sadd.s32 4294967295, %s2330_s29   ;;  %s1721_s30 = sadd.s32 4294967294, %s2330_s29   ;;  %s2330_s29 = sphi %s2384_s29, %s2781_s29   ;;  %s2326_s28 = sphi %s2382_s28, %s2780_s28   ;;  %s2322_s27 = sphi %s2380_s27, %s2779_s27   ;;  %s2318_s26 = sphi %s2378_s26, %s2778_s26  }
   0x7   : > { %s2401_s8 = sadd.s32 1, %s2330_s29   ;;  %s181_s9 = sadd.s32 1, %s2326_s28 }
   0x8   : > { %s178_s10 = ssub.s32 %s2330_s29, %s2401_s8  ;;  %p191_p0 = scmp.ne.s32.totalorder %s2326_s28, %s2322_s27 }
   0x9   : > { %p179_p1 = scmp.eq.s32.totalorder %s178_s10, 0  ;;  %p192_p2 = scmp.eq.s32.totalorder %s1720_s6, 1 }
   0xa   : > { %p197_p3 = scmp.ne.s32.totalorder %s2322_s27, %s2318_s26  ;;  %p198_p4 = scmp.eq.s32.totalorder %s1721_s30, 1 }
   0xb   : > { %s2411_s11 = scalar_select %p179_p1, %s2326_s28, %s181_s9  }
   0xc   : > { %p2413_p5 = por %p192_p2, %p191_p0  ;;  %p2417_p6 = por %p198_p4, %p197_p3 }
   0xd   : > { %p1724_p7 = scmp.ge.s32.totalorder %s2330_s29, 1  ;;  %p243_p8 = scmp.lt.s32.totalorder %s2330_s29, 3 }
   0xf   : > { %p244_p9 = pnand %p1724_p7, %p243_p8 }
  0x10   : > { %v2210_v1 = vld [vmem:[%s2769_s1] sm:$0xff] (!%p244_p9)   ;;  %s2426_s16 = sshll.u32 (!%p244_p9), %s1720_s6, 6  ;;  %v2211_v2 = vld [vmem:[%s2769_s1 + $0x8] sm:$0xff] (!%p244_p9)   ;;  %vm530_vm0 = vcmask (!%p244_p9), 261120   ;;  %v2246_v5 = vld [vmem:[%s2771_s3 + $0x10] sm:$0xff] (!%p244_p9)   ;;  %s272_s15 = sand.u32 (!%p244_p9), 1, %s2322_s27  }
  0x11   : > { %247 = sbr.rel (%p244_p9) target bundleno = 896 (0x380), region = 48  ;;  %p276_p10 = scmp.lt.s32.totalorder (!%p244_p9), %s2426_s16, 127  ;;  %1956 = vmatprep.subr.bf16.mxu0 (!%p244_p9), %v2210_v1  ;;  %v2244_v3 = vld [vmem:[%s2771_s3] sm:$0xff] (!%p244_p9)   ;;  %v2245_v4 = vld [vmem:[%s2771_s3 + $0x8] sm:$0xff] (!%p244_p9)   ;;  %v2247_v9 = vld [vmem:[%s2771_s3 + $0x18] sm:$0xff] (!%p244_p9)  }
  0x12   : > { %1957 = vmatpush3.bf16.msra.mxu0 (!%p244_p9), %v2210_v1  ;;  %2024 = vmatprep.subr.bf16.mxu1 (!%p244_p9), %v2244_v3  ;;  %v2248_v10 = vld [vmem:[%s2771_s3 + $0x20] sm:$0xff] (!%p244_p9)   ;;  %v2249_v19 = vld [vmem:[%s2771_s3 + $0x28] sm:$0xff] (!%p244_p9)   ;;  %v2250_v33 = vld [vmem:[%s2771_s3 + $0x30] sm:$0xff] (!%p244_p9)   ;;  %s1725_s17 = sshll.u32 (!%p244_p9), %s272_s15, 2  ;;  %s2726_s22 = scalar_lea.hbm (!%p244_p9), %s2775_s7, %s2426_s16 }
  0x13   : > { %1958 = vmatprep.subr.bf16.mxu0 (!%p244_p9), %v2211_v2  ;;  %2025 = vmatpush3.bf16.msra.mxu1 (!%p244_p9), %v2244_v3  ;;  %v2251_v35 = vld [vmem:[%s2771_s3 + $0x38] sm:$0xff] (!%p244_p9)   ;;  %v2529_v43 = vld [vmem:[%s2770_s2] ss:$0 sm:$0xff] (!%p244_p9)  ;;  %s274_s18 = scalar_lea.vmem (!%p244_p9), [#allocation3], %s1725_s17  ;;  %s1648_s23 = scalar_lea.sflag (!%p244_p9), [#allocation4], %s272_s15 }
  0x14   : > { %2026 = vmatprep.subr.bf16.mxu1 (!%p244_p9), %v2245_v4  ;;  %s1662_s19 = sshll.u32 (!%p244_p9), %s274_s18, 4  ;;  %s2334_s25 = smov (!%p244_p9), [#allocation3]   ;;  %s2728_s19 = int_to_ptr.vmem [resolvable:$true] %s1662_s19 }
  0x15   : > { %s2272_s6 = sshll.u32 (!%p244_p9), %s2334_s25, 4  ;;  %s2273_s6 = int_to_ptr.vmem [resolvable:$false] %s2272_s6 }
  0x16   : > { %1959 = vmatpush3.bf16.msra.mxu0 (!%p244_p9), %v2211_v2  ;;  %p2275_p0 = scmp.lt.s32.totalorder (!%p244_p9), %s2728_s19, %s2273_s6 }
  0x17   : > { %2027 = vmatpush3.bf16.msra.mxu1 (!%p244_p9), %v2245_v4 }
  0x18   : > { %s277_s21 = scalar_select %p276_p10, %s2426_s16, 127  ;;  %2028 = vmatprep.subr.bf16.mxu1 %v2246_v5 }
  0x1a   : > { %s1727_s24 = sshll.u32 %s277_s21, 2 }
  0x1b   : > { %s2442_s30 = scalar_lea.vmem %s2768_s0, %s1727_s24  ;;  %2029 = vmatpush3.bf16.msra.mxu1 %v2246_v5  ;;  %s2268_s24 = scalar_lea.vmem %s2728_s19, 64 }
  0x1c   : > { %v2212_v6 = vld [vmem:[%s2442_s30] sm:$0xff]   ;;  %v2213_v7 = vld [vmem:[%s2442_s30 + $0x8] sm:$0xff]   ;;  %v2214_v8 = vld [vmem:[%s2442_s30 + $0x10] sm:$0xff]   ;;  %2030 = vmatprep.subr.bf16.mxu1 %v2247_v9  ;;  %p2269_p11 = scmp.ne.s32.totalorder %s2728_s19, %s2268_s24 }
  0x1d   : > { %1960 = vmatprep.mubr.msk.bf16.mxu0 %vm530_vm0, %v2212_v6  ;;  %v2215_v11 = vld [vmem:[%s2442_s30 + $0x18] sm:$0xff]   ;;  %v2216_v12 = vld [vmem:[%s2442_s30 + $0x20] sm:$0xff]   ;;  %v2217_v13 = vld [vmem:[%s2442_s30 + $0x28] sm:$0xff]  }
  0x1e   : > { %1961 = vmatmul.mubr.msk.bf16.vlgmr.msra.gmra.mrb[0].mxu0 %vm530_vm0, %v2213_v7  ;;  %v2218_v14 = vld [vmem:[%s2442_s30 + $0x30] sm:$0xff]   ;;  %v2219_v15 = vld [vmem:[%s2442_s30 + $0x38] sm:$0xff]   ;;  %v2220_v16 = vld [vmem:[%s2442_s30 + $0x40] sm:$0xff]   ;;  %p2270_p12 = pnand %p2269_p11, %p2413_p5 }
  0x1f   : > { %1964 = vmatprep.mubr.msk.bf16.mxu0 %vm530_vm0, %v2214_v8  ;;  %2031 = vmatpush3.bf16.msra.mxu1 %v2247_v9  ;;  %v2221_v17 = vld [vmem:[%s2442_s30 + $0x48] sm:$0xff]   ;;  %v2222_v18 = vld [vmem:[%s2442_s30 + $0x50] sm:$0xff]   ;;  %v2223_v20 = vld [vmem:[%s2442_s30 + $0x58] sm:$0xff]  }
  0x20   : > { %2032 = vmatprep.subr.bf16.mxu1 %v2248_v10  ;;  %v2224_v21 = vld [vmem:[%s2442_s30 + $0x60] sm:$0xff]   ;;  %v2225_v22 = vld [vmem:[%s2442_s30 + $0x68] sm:$0xff]   ;;  %v2226_v23 = vld [vmem:[%s2442_s30 + $0x70] sm:$0xff]   ;;  %p2271_p13 = pneg %p2270_p12 }
  0x21   : > { %v2227_v24 = vld [vmem:[%s2442_s30 + $0x78] sm:$0xff]   ;;  %v2228_v25 = vld [vmem:[%s2442_s30 + $0x80] sm:$0xff]   ;;  %v2229_v26 = vld [vmem:[%s2442_s30 + $0x88] sm:$0xff]  }
  0x22   : > { %v2230_v27 = vld [vmem:[%s2442_s30 + $0x90] sm:$0xff]   ;;  %v2231_v28 = vld [vmem:[%s2442_s30 + $0x98] sm:$0xff]   ;;  %v2232_v29 = vld [vmem:[%s2442_s30 + $0xa0] sm:$0xff]  }
  0x23   : > { %2033 = vmatpush3.bf16.msra.mxu1 %v2248_v10  ;;  %v2233_v30 = vld [vmem:[%s2442_s30 + $0xa8] sm:$0xff]   ;;  %v2234_v31 = vld [vmem:[%s2442_s30 + $0xb0] sm:$0xff]   ;;  %v2235_v32 = vld [vmem:[%s2442_s30 + $0xb8] sm:$0xff]  }
  0x24   : > { %2034 = vmatprep.subr.bf16.mxu1 %v2249_v19  ;;  %v2236_v34 = vld [vmem:[%s2442_s30 + $0xc0] sm:$0xff]   ;;  %v2237_v36 = vld [vmem:[%s2442_s30 + $0xc8] sm:$0xff]   ;;  %v2238_v37 = vld [vmem:[%s2442_s30 + $0xd0] sm:$0xff]  }
  0x25   : > { %v2239_v38 = vld [vmem:[%s2442_s30 + $0xd8] sm:$0xff]   ;;  %v2240_v39 = vld [vmem:[%s2442_s30 + $0xe0] sm:$0xff]   ;;  %v2241_v40 = vld [vmem:[%s2442_s30 + $0xe8] sm:$0xff]  }
  0x26   : > { %1965 = vmatmul.mubr.msk.bf16.gmra.mrb[4].mxu0 %vm530_vm0, %v2215_v11  ;;  %v2242_v41 = vld [vmem:[%s2442_s30 + $0xf0] sm:$0xff]   ;;  %v2243_v42 = vld [vmem:[%s2442_s30 + $0xf8] sm:$0xff]   ;;  %s2274_s30 = scalar_lea.vmem %s2273_s6, 128 }
  0x27   : > { %1968 = vmatprep.mubr.msk.bf16.mxu0 %vm530_vm0, %v2216_v12  ;;  %2035 = vmatpush3.bf16.msra.mxu1 %v2249_v19  ;;  %p2276_p1 = scmp.lt.s32.totalorder %s2274_s30, %s2268_s24 }
  0x28   : > { %2036 = vmatprep.subr.bf16.mxu1 %v2250_v33 }
  0x29   : > { %p2277_p2 = por %p2276_p1, %p2275_p0 }
  0x2b   : > { %2037 = vmatpush3.bf16.msra.mxu1 %v2250_v33  ;;  %p2278_p3 = pnand %p2277_p2, %p2271_p13 }
  0x2c   : > { %2038 = vmatprep.subr.bf16.mxu1 %v2251_v35 }
  0x2e   : > { %1969 = vmatmul.mubr.msk.bf16.gmra.mrb[8].mxu0 %vm530_vm0, %v2217_v13 }
  0x2f   : > { %1972 = vmatprep.mubr.msk.bf16.mxu0 %vm530_vm0, %v2218_v14  ;;  %2039 = vmatpush3.bf16.msra.mxu1 %v2251_v35 }
  0x36   : > { %1973 = vmatmul.mubr.msk.bf16.gmra.mrb[12].mxu0 %vm530_vm0, %v2219_v15 }
  0x37   : > { %1976 = vmatprep.mubr.msk.bf16.mxu0 %vm530_vm0, %v2220_v16 }
  0x3e   : > { %1977 = vmatmul.mubr.msk.bf16.gmra.mrb[16].mxu0 %vm530_vm0, %v2221_v17 }
  0x3f   : > { %1980 = vmatprep.mubr.msk.bf16.mxu0 %vm530_vm0, %v2222_v18 }
  0x46   : > { %1981 = vmatmul.mubr.msk.bf16.gmra.mrb[20].mxu0 %vm530_vm0, %v2223_v20 }
  0x47   : > { %1984 = vmatprep.mubr.msk.bf16.mxu0 %vm530_vm0, %v2224_v21 }
  0x4e   : > { %1985 = vmatmul.mubr.msk.bf16.gmra.mrb[24].mxu0 %vm530_vm0, %v2225_v22 }
  0x4f   : > { %1988 = vmatprep.mubr.msk.bf16.mxu0 %vm530_vm0, %v2226_v23 }
  0x56   : > { %1989 = vmatmul.mubr.msk.bf16.gmra.mrb[28].mxu0 %vm530_vm0, %v2227_v24 }
  0x57   : > { %1992 = vmatprep.mubr.msk.bf16.mxu0 %vm530_vm0, %v2228_v25 }
  0x5e   : > { %1993 = vmatmul.mubr.msk.bf16.gmra.mrb[32].mxu0 %vm530_vm0, %v2229_v26 }
  0x5f   : > { %1996 = vmatprep.mubr.msk.bf16.mxu0 %vm530_vm0, %v2230_v27 }
  0x66   : > { %1997 = vmatmul.mubr.msk.bf16.gmra.mrb[36].mxu0 %vm530_vm0, %v2231_v28 }
  0x67   : > { %2000 = vmatprep.mubr.msk.bf16.mxu0 %vm530_vm0, %v2232_v29 }
  0x6e   : > { %2001 = vmatmul.mubr.msk.bf16.gmra.mrb[40].mxu0 %vm530_vm0, %v2233_v30 }
  0x6f   : > { %2004 = vmatprep.mubr.msk.bf16.mxu0 %vm530_vm0, %v2234_v31 }
  0x76   : > { %2005 = vmatmul.mubr.msk.bf16.gmra.mrb[44].mxu0 %vm530_vm0, %v2235_v32 }
  0x77   : > { %2008 = vmatprep.mubr.msk.bf16.mxu0 %vm530_vm0, %v2236_v34 }
  0x7e   : > { %2009 = vmatmul.mubr.msk.bf16.gmra.mrb[48].mxu0 %vm530_vm0, %v2237_v36 }
  0x7f   : > { %2012 = vmatprep.mubr.msk.bf16.mxu0 %vm530_vm0, %v2238_v37 }
  0x86   : > { %2013 = vmatmul.mubr.msk.bf16.gmra.mrb[52].mxu0 %vm530_vm0, %v2239_v38 }
  0x87   : > { %2016 = vmatprep.mubr.msk.bf16.mxu0 %vm530_vm0, %v2240_v39 }
  0x8e   : > { %2017 = vmatmul.mubr.msk.bf16.gmra.mrb[56].mxu0 %vm530_vm0, %v2241_v40 }
  0x8f   : > { %2020 = vmatprep.mubr.msk.bf16.mxu0 %vm530_vm0, %v2242_v41 }
  0x96   : > { %2021 = vmatmul.mubr.msk.bf16.gmra.mrb[60].mxu0 %vm530_vm0, %v2243_v42 }
  0xf1   : > { %v1962_v44 = vpop.f32.mrb[0].mxu0 }
  0xf2   : > { %v670_v45 = vadd.f32 %v1962_v44, %v2529_v43  ;;  %v661_v46 = vpop.f32.mrb[1].mxu0 }
  0xf3   : > { %v662_v47 = vadd.f32 %v2529_v43, %v661_v46  ;;  %v1963_v48 = vpop.f32.mrb[2].mxu0 }
  0xf4   : > { %v673_v49 = vadd.f32 %v1963_v48, %v2529_v43  ;;  %v664_v50 = vpop.f32.mrb[3].mxu0  ;;  %v918_v52 = vmax.f32 %v670_v45, 0.0 }
  0xf5   : > { %v665_v51 = vadd.f32 %v2529_v43, %v664_v50  ;;  %v916_v54 = vmax.f32 %v662_v47, 0.0 }
  0xf6   : > { %v919_v53 = vmax.f32 %v673_v49, 0.0 }
  0xf7   : > { %v917_v55 = vmax.f32 %v665_v51, 0.0 }
  0xf8   : > { %v981_v56 = vpack.c.bf16 %v919_v53, %v918_v52 }
  0xf9   : > { %v1966_v57 = vpop.f32.mrb[4].mxu0  ;;  %v980_v58 = vpack.c.bf16 %v917_v55, %v916_v54 }
  0xfa   : > { %v686_v59 = vadd.f32 %v1966_v57, %v2529_v43  ;;  %v677_v60 = vpop.f32.mrb[5].mxu0 }
  0xfb   : > { %v678_v61 = vadd.f32 %v2529_v43, %v677_v60  ;;  %v1967_v62 = vpop.f32.mrb[6].mxu0  ;;  %2040 = vmatprep.mubr.bf16.mxu1 %v980_v58 }
  0xfc   : > { %v689_v63 = vadd.f32 %v1967_v62, %v2529_v43  ;;  %v680_v0 = vpop.f32.mrb[7].mxu0  ;;  %2041 = vmatmul.mubr.bf16.vlgmr.msra.gmra.mrb[0].mxu1 %v981_v56  ;;  %v922_v2 = vmax.f32 %v686_v59, 0.0 }
  0xfd   : > { %v681_v1 = vadd.f32 %v2529_v43, %v680_v0  ;;  %v920_v4 = vmax.f32 %v678_v61, 0.0 }
  0xfe   : > { %v923_v3 = vmax.f32 %v689_v63, 0.0 }
  0xff   : > { %v921_v5 = vmax.f32 %v681_v1, 0.0 }
 0x100   : > { %v983_v6 = vpack.c.bf16 %v923_v3, %v922_v2 }
 0x101   : > { %v982_v7 = vpack.c.bf16 %v921_v5, %v920_v4  ;;  %v1970_v8 = vpop.f32.mrb[8].mxu0 }
 0x102   : > { %v702_v9 = vadd.f32 %v1970_v8, %v2529_v43  ;;  %v693_v10 = vpop.f32.mrb[9].mxu0 }
 0x103   : > { %v694_v11 = vadd.f32 %v2529_v43, %v693_v10  ;;  %v1971_v12 = vpop.f32.mrb[10].mxu0  ;;  %2044 = vmatprep.mubr.bf16.mxu1 %v982_v7 }
 0x104   : > { %v705_v13 = vadd.f32 %v1971_v12, %v2529_v43  ;;  %v696_v14 = vpop.f32.mrb[11].mxu0  ;;  %2045 = vmatmul.mubr.bf16.gmra.mrb[4].mxu1 %v983_v6  ;;  %v926_v16 = vmax.f32 %v702_v9, 0.0 }
 0x105   : > { %v697_v15 = vadd.f32 %v2529_v43, %v696_v14  ;;  %v924_v18 = vmax.f32 %v694_v11, 0.0 }
 0x106   : > { %v927_v17 = vmax.f32 %v705_v13, 0.0 }
 0x107   : > { %v925_v19 = vmax.f32 %v697_v15, 0.0 }
 0x108   : > { %v985_v20 = vpack.c.bf16 %v927_v17, %v926_v16 }
 0x109   : > { %v984_v21 = vpack.c.bf16 %v925_v19, %v924_v18  ;;  %v1974_v22 = vpop.f32.mrb[12].mxu0 }
 0x10a   : > { %v718_v23 = vadd.f32 %v1974_v22, %v2529_v43  ;;  %v709_v24 = vpop.f32.mrb[13].mxu0 }
 0x10b   : > { %v710_v25 = vadd.f32 %v2529_v43, %v709_v24  ;;  %v1975_v26 = vpop.f32.mrb[14].mxu0  ;;  %2048 = vmatprep.mubr.bf16.mxu1 %v984_v21 }
 0x10c   : > { %v721_v27 = vadd.f32 %v1975_v26, %v2529_v43  ;;  %v712_v28 = vpop.f32.mrb[15].mxu0  ;;  %2049 = vmatmul.mubr.bf16.gmra.mrb[8].mxu1 %v985_v20  ;;  %v930_v30 = vmax.f32 %v718_v23, 0.0 }
 0x10d   : > { %v713_v29 = vadd.f32 %v2529_v43, %v712_v28  ;;  %v928_v32 = vmax.f32 %v710_v25, 0.0 }
 0x10e   : > { %v931_v31 = vmax.f32 %v721_v27, 0.0 }
 0x10f   : > { %v929_v33 = vmax.f32 %v713_v29, 0.0 }
 0x110   : > { %v987_v34 = vpack.c.bf16 %v931_v31, %v930_v30 }
 0x111   : > { %v986_v35 = vpack.c.bf16 %v929_v33, %v928_v32  ;;  %v1978_v36 = vpop.f32.mrb[16].mxu0 }
 0x112   : > { %v734_v37 = vadd.f32 %v1978_v36, %v2529_v43  ;;  %v725_v38 = vpop.f32.mrb[17].mxu0 }
 0x113   : > { %v726_v39 = vadd.f32 %v2529_v43, %v725_v38  ;;  %v1979_v40 = vpop.f32.mrb[18].mxu0  ;;  %2052 = vmatprep.mubr.bf16.mxu1 %v986_v35 }
 0x114   : > { %v737_v41 = vadd.f32 %v1979_v40, %v2529_v43  ;;  %v728_v42 = vpop.f32.mrb[19].mxu0  ;;  %2053 = vmatmul.mubr.bf16.gmra.mrb[12].mxu1 %v987_v34  ;;  %v934_v45 = vmax.f32 %v734_v37, 0.0 }
 0x115   : > { %v729_v44 = vadd.f32 %v2529_v43, %v728_v42  ;;  %v932_v47 = vmax.f32 %v726_v39, 0.0 }
 0x116   : > { %v935_v46 = vmax.f32 %v737_v41, 0.0 }
 0x117   : > { %v933_v48 = vmax.f32 %v729_v44, 0.0 }
 0x118   : > { %v989_v49 = vpack.c.bf16 %v935_v46, %v934_v45 }
 0x119   : > { %v988_v50 = vpack.c.bf16 %v933_v48, %v932_v47  ;;  %v1982_v51 = vpop.f32.mrb[20].mxu0 }
 0x11a   : > { %v750_v52 = vadd.f32 %v1982_v51, %v2529_v43  ;;  %v741_v53 = vpop.f32.mrb[21].mxu0 }
 0x11b   : > { %v742_v54 = vadd.f32 %v2529_v43, %v741_v53  ;;  %v1983_v55 = vpop.f32.mrb[22].mxu0  ;;  %2056 = vmatprep.mubr.bf16.mxu1 %v988_v50 }
 0x11c   : > { %v753_v56 = vadd.f32 %v1983_v55, %v2529_v43  ;;  %v744_v57 = vpop.f32.mrb[23].mxu0  ;;  %2057 = vmatmul.mubr.bf16.gmra.mrb[16].mxu1 %v989_v49  ;;  %v938_v59 = vmax.f32 %v750_v52, 0.0 }
 0x11d   : > { %v745_v58 = vadd.f32 %v2529_v43, %v744_v57  ;;  %v936_v61 = vmax.f32 %v742_v54, 0.0 }
 0x11e   : > { %v939_v60 = vmax.f32 %v753_v56, 0.0 }
 0x11f   : > { %v937_v62 = vmax.f32 %v745_v58, 0.0 }
 0x120   : > { %v991_v63 = vpack.c.bf16 %v939_v60, %v938_v59 }
 0x121   : > { %v990_v0 = vpack.c.bf16 %v937_v62, %v936_v61  ;;  %v1986_v1 = vpop.f32.mrb[24].mxu0 }
 0x122   : > { %v766_v2 = vadd.f32 %v1986_v1, %v2529_v43  ;;  %v757_v3 = vpop.f32.mrb[25].mxu0 }
 0x123   : > { %v758_v4 = vadd.f32 %v2529_v43, %v757_v3  ;;  %v1987_v5 = vpop.f32.mrb[26].mxu0  ;;  %2060 = vmatprep.mubr.bf16.mxu1 %v990_v0 }
 0x124   : > { %v769_v6 = vadd.f32 %v1987_v5, %v2529_v43  ;;  %v760_v7 = vpop.f32.mrb[27].mxu0  ;;  %2061 = vmatmul.mubr.bf16.gmra.mrb[20].mxu1 %v991_v63  ;;  %v942_v9 = vmax.f32 %v766_v2, 0.0 }
 0x125   : > { %v761_v8 = vadd.f32 %v2529_v43, %v760_v7  ;;  %v940_v11 = vmax.f32 %v758_v4, 0.0 }
 0x126   : > { %v943_v10 = vmax.f32 %v769_v6, 0.0 }
 0x127   : > { %v941_v12 = vmax.f32 %v761_v8, 0.0 }
 0x128   : > { %v993_v13 = vpack.c.bf16 %v943_v10, %v942_v9 }
 0x129   : > { %v992_v14 = vpack.c.bf16 %v941_v12, %v940_v11  ;;  %v1990_v15 = vpop.f32.mrb[28].mxu0 }
 0x12a   : > { %v782_v16 = vadd.f32 %v1990_v15, %v2529_v43  ;;  %v773_v17 = vpop.f32.mrb[29].mxu0 }
 0x12b   : > { %v774_v18 = vadd.f32 %v2529_v43, %v773_v17  ;;  %v1991_v19 = vpop.f32.mrb[30].mxu0  ;;  %2064 = vmatprep.mubr.bf16.mxu1 %v992_v14 }
 0x12c   : > { %v785_v20 = vadd.f32 %v1991_v19, %v2529_v43  ;;  %v776_v21 = vpop.f32.mrb[31].mxu0  ;;  %2065 = vmatmul.mubr.bf16.gmra.mrb[24].mxu1 %v993_v13  ;;  %v946_v23 = vmax.f32 %v782_v16, 0.0 }
 0x12d   : > { %v777_v22 = vadd.f32 %v2529_v43, %v776_v21  ;;  %v944_v25 = vmax.f32 %v774_v18, 0.0 }
 0x12e   : > { %v947_v24 = vmax.f32 %v785_v20, 0.0 }
 0x12f   : > { %v945_v26 = vmax.f32 %v777_v22, 0.0 }
 0x130   : > { %v995_v27 = vpack.c.bf16 %v947_v24, %v946_v23 }
 0x131   : > { %v994_v28 = vpack.c.bf16 %v945_v26, %v944_v25  ;;  %v1994_v29 = vpop.f32.mrb[32].mxu0 }
 0x132   : > { %v798_v30 = vadd.f32 %v1994_v29, %v2529_v43  ;;  %v789_v31 = vpop.f32.mrb[33].mxu0 }
 0x133   : > { %v790_v32 = vadd.f32 %v2529_v43, %v789_v31  ;;  %v1995_v33 = vpop.f32.mrb[34].mxu0  ;;  %2068 = vmatprep.mubr.bf16.mxu1 %v994_v28 }
 0x134   : > { %v801_v34 = vadd.f32 %v1995_v33, %v2529_v43  ;;  %v792_v35 = vpop.f32.mrb[35].mxu0  ;;  %2069 = vmatmul.mubr.bf16.gmra.mrb[28].mxu1 %v995_v27  ;;  %v950_v37 = vmax.f32 %v798_v30, 0.0 }
 0x135   : > { %v793_v36 = vadd.f32 %v2529_v43, %v792_v35  ;;  %v948_v39 = vmax.f32 %v790_v32, 0.0 }
 0x136   : > { %v951_v38 = vmax.f32 %v801_v34, 0.0 }
 0x137   : > { %v949_v40 = vmax.f32 %v793_v36, 0.0 }
 0x138   : > { %v997_v41 = vpack.c.bf16 %v951_v38, %v950_v37 }
 0x139   : > { %v996_v42 = vpack.c.bf16 %v949_v40, %v948_v39  ;;  %v1998_v44 = vpop.f32.mrb[36].mxu0 }
 0x13a   : > { %v814_v45 = vadd.f32 %v1998_v44, %v2529_v43  ;;  %v805_v46 = vpop.f32.mrb[37].mxu0 }
 0x13b   : > { %v806_v47 = vadd.f32 %v2529_v43, %v805_v46  ;;  %v1999_v48 = vpop.f32.mrb[38].mxu0  ;;  %2072 = vmatprep.mubr.bf16.mxu1 %v996_v42 }
 0x13c   : > { %v817_v49 = vadd.f32 %v1999_v48, %v2529_v43  ;;  %v808_v50 = vpop.f32.mrb[39].mxu0  ;;  %2073 = vmatmul.mubr.bf16.gmra.mrb[32].mxu1 %v997_v41  ;;  %v954_v52 = vmax.f32 %v814_v45, 0.0 }
 0x13d   : > { %v809_v51 = vadd.f32 %v2529_v43, %v808_v50  ;;  %v952_v54 = vmax.f32 %v806_v47, 0.0 }
 0x13e   : > { %v955_v53 = vmax.f32 %v817_v49, 0.0 }
 0x13f   : > { %v953_v55 = vmax.f32 %v809_v51, 0.0 }
 0x140   : > { %v999_v56 = vpack.c.bf16 %v955_v53, %v954_v52 }
 0x141   : > { %v998_v57 = vpack.c.bf16 %v953_v55, %v952_v54  ;;  %v2002_v58 = vpop.f32.mrb[40].mxu0 }
 0x142   : > { %v830_v59 = vadd.f32 %v2002_v58, %v2529_v43  ;;  %v821_v60 = vpop.f32.mrb[41].mxu0 }
 0x143   : > { %v822_v61 = vadd.f32 %v2529_v43, %v821_v60  ;;  %v2003_v62 = vpop.f32.mrb[42].mxu0  ;;  %2076 = vmatprep.mubr.bf16.mxu1 %v998_v57 }
 0x144   : > { %v833_v63 = vadd.f32 %v2003_v62, %v2529_v43  ;;  %v824_v0 = vpop.f32.mrb[43].mxu0  ;;  %2077 = vmatmul.mubr.bf16.gmra.mrb[36].mxu1 %v999_v56  ;;  %v958_v2 = vmax.f32 %v830_v59, 0.0 }
 0x145   : > { %v825_v1 = vadd.f32 %v2529_v43, %v824_v0  ;;  %v956_v4 = vmax.f32 %v822_v61, 0.0 }
 0x146   : > { %v959_v3 = vmax.f32 %v833_v63, 0.0 }
 0x147   : > { %v957_v5 = vmax.f32 %v825_v1, 0.0 }
 0x148   : > { %v1001_v6 = vpack.c.bf16 %v959_v3, %v958_v2 }
 0x149   : > { %v1000_v7 = vpack.c.bf16 %v957_v5, %v956_v4  ;;  %v2006_v8 = vpop.f32.mrb[44].mxu0 }
 0x14a   : > { %v846_v9 = vadd.f32 %v2006_v8, %v2529_v43  ;;  %v837_v10 = vpop.f32.mrb[45].mxu0 }
 0x14b   : > { %v838_v11 = vadd.f32 %v2529_v43, %v837_v10  ;;  %v2007_v12 = vpop.f32.mrb[46].mxu0  ;;  %2080 = vmatprep.mubr.bf16.mxu1 %v1000_v7 }
 0x14c   : > { %v849_v13 = vadd.f32 %v2007_v12, %v2529_v43  ;;  %v840_v14 = vpop.f32.mrb[47].mxu0  ;;  %2081 = vmatmul.mubr.bf16.gmra.mrb[40].mxu1 %v1001_v6  ;;  %v962_v16 = vmax.f32 %v846_v9, 0.0 }
 0x14d   : > { %v841_v15 = vadd.f32 %v2529_v43, %v840_v14  ;;  %v960_v18 = vmax.f32 %v838_v11, 0.0 }
 0x14e   : > { %v963_v17 = vmax.f32 %v849_v13, 0.0 }
 0x14f   : > { %v961_v19 = vmax.f32 %v841_v15, 0.0  ;;  %v2598_v15 = vld [vmem:[%s2772_s4] ss:$0 sm:$0xff] }
 0x150   : > { %v1003_v20 = vpack.c.bf16 %v963_v17, %v962_v16 }
 0x151   : > { %v1002_v21 = vpack.c.bf16 %v961_v19, %v960_v18  ;;  %v2010_v22 = vpop.f32.mrb[48].mxu0 }
 0x152   : > { %v862_v23 = vadd.f32 %v2010_v22, %v2529_v43  ;;  %v853_v24 = vpop.f32.mrb[49].mxu0 }
 0x153   : > { %v854_v25 = vadd.f32 %v2529_v43, %v853_v24  ;;  %v2011_v26 = vpop.f32.mrb[50].mxu0  ;;  %2084 = vmatprep.mubr.bf16.mxu1 %v1002_v21 }
 0x154   : > { %v865_v27 = vadd.f32 %v2011_v26, %v2529_v43  ;;  %v856_v28 = vpop.f32.mrb[51].mxu0  ;;  %2085 = vmatmul.mubr.bf16.gmra.mrb[44].mxu1 %v1003_v20  ;;  %v966_v30 = vmax.f32 %v862_v23, 0.0 }
 0x155   : > { %v857_v29 = vadd.f32 %v2529_v43, %v856_v28  ;;  %v964_v32 = vmax.f32 %v854_v25, 0.0 }
 0x156   : > { %v967_v31 = vmax.f32 %v865_v27, 0.0 }
 0x157   : > { %v965_v33 = vmax.f32 %v857_v29, 0.0 }
 0x158   : > { %v1005_v34 = vpack.c.bf16 %v967_v31, %v966_v30 }
 0x159   : > { %v1004_v35 = vpack.c.bf16 %v965_v33, %v964_v32  ;;  %v2014_v36 = vpop.f32.mrb[52].mxu0 }
 0x15a   : > { %v878_v37 = vadd.f32 %v2014_v36, %v2529_v43  ;;  %v869_v38 = vpop.f32.mrb[53].mxu0 }
 0x15b   : > { %2088 = vmatprep.mubr.bf16.mxu1 %v1004_v35  ;;  %v870_v39 = vadd.f32 %v2529_v43, %v869_v38  ;;  %v2015_v40 = vpop.f32.mrb[54].mxu0 }
 0x15c   : > { %2089 = vmatmul.mubr.bf16.gmra.mrb[48].mxu1 %v1005_v34  ;;  %v970_v41 = vmax.f32 %v878_v37, 0.0  ;;  %v881_v42 = vadd.f32 %v2015_v40, %v2529_v43  ;;  %v872_v44 = vpop.f32.mrb[55].mxu0 }
 0x15d   : > { %v968_v45 = vmax.f32 %v870_v39, 0.0  ;;  %v873_v46 = vadd.f32 %v2529_v43, %v872_v44 }
 0x15e   : > { %v971_v47 = vmax.f32 %v881_v42, 0.0 }
 0x15f   : > { %v969_v48 = vmax.f32 %v873_v46, 0.0 }
 0x160   : > { %v1007_v49 = vpack.c.bf16 %v971_v47, %v970_v41 }
 0x161   : > { %v1006_v50 = vpack.c.bf16 %v969_v48, %v968_v45  ;;  %v2018_v51 = vpop.f32.mrb[56].mxu0 }
 0x162   : > { %v894_v52 = vadd.f32 %v2018_v51, %v2529_v43  ;;  %v885_v53 = vpop.f32.mrb[57].mxu0 }
 0x163   : > { %2092 = vmatprep.mubr.bf16.mxu1 %v1006_v50  ;;  %v886_v54 = vadd.f32 %v2529_v43, %v885_v53  ;;  %v2019_v55 = vpop.f32.mrb[58].mxu0 }
 0x164   : > { %2093 = vmatmul.mubr.bf16.gmra.mrb[52].mxu1 %v1007_v49  ;;  %v974_v56 = vmax.f32 %v894_v52, 0.0  ;;  %v897_v57 = vadd.f32 %v2019_v55, %v2529_v43  ;;  %v888_v58 = vpop.f32.mrb[59].mxu0 }
 0x165   : > { %v972_v59 = vmax.f32 %v886_v54, 0.0  ;;  %v889_v60 = vadd.f32 %v2529_v43, %v888_v58 }
 0x166   : > { %v975_v61 = vmax.f32 %v897_v57, 0.0 }
 0x167   : > { %v973_v62 = vmax.f32 %v889_v60, 0.0 }
 0x168   : > { %v1009_v63 = vpack.c.bf16 %v975_v61, %v974_v56 }
 0x169   : > { %v1008_v0 = vpack.c.bf16 %v973_v62, %v972_v59  ;;  %v2022_v1 = vpop.f32.mrb[60].mxu0 }
 0x16a   : > { %v910_v2 = vadd.f32 %v2022_v1, %v2529_v43  ;;  %v901_v3 = vpop.f32.mrb[61].mxu0 }
 0x16b   : > { %2096 = vmatprep.mubr.bf16.mxu1 %v1008_v0  ;;  %v902_v4 = vadd.f32 %v2529_v43, %v901_v3  ;;  %v2023_v5 = vpop.f32.mrb[62].mxu0 }
 0x16c   : > { %2097 = vmatmul.mubr.bf16.gmra.mrb[56].mxu1 %v1009_v63  ;;  %v978_v6 = vmax.f32 %v910_v2, 0.0  ;;  %v913_v7 = vadd.f32 %v2023_v5, %v2529_v43  ;;  %v904_v8 = vpop.f32.mrb[63].mxu0 }
 0x16d   : > { %v976_v9 = vmax.f32 %v902_v4, 0.0  ;;  %v905_v10 = vadd.f32 %v2529_v43, %v904_v8 }
 0x16e   : > { %v979_v11 = vmax.f32 %v913_v7, 0.0 }
 0x16f   : > { %v977_v12 = vmax.f32 %v905_v10, 0.0 }
 0x170   : > { %v1011_v13 = vpack.c.bf16 %v979_v11, %v978_v6 }
 0x171   : > { %v1010_v14 = vpack.c.bf16 %v977_v12, %v976_v9 }
 0x173   : > { %2100 = vmatprep.mubr.bf16.mxu1 %v1010_v14 }
 0x174   : > { %2101 = vmatmul.mubr.bf16.gmra.mrb[60].mxu1 %v1011_v13 }
 0x1cf   : > { %v2042_v16 = vpop.f32.mrb[0].mxu1 }
 0x1d0   : > { %v1126_v17 = vadd.f32 %v2042_v16, %v2598_v15  ;;  %v1117_v18 = vpop.f32.mrb[1].mxu1  ;;  %v2638_v16 = vld [vmem:[%s2773_s5] sm:$0x1] }
 0x1d1   : > { %v1118_v19 = vadd.f32 %v2598_v15, %v1117_v18  ;;  %v2043_v20 = vpop.f32.mrb[2].mxu1  ;;  %1920 = vmatprep.mubr.f32.mxu0 %v2638_v16  ;;  %1954 = vmatprep.mubr.f32.mxu1 %v2638_v16 }
 0x1d2   : > { %v1129_v43 = vadd.f32 %v2043_v20, %v2598_v15  ;;  %v1120_v21 = vpop.f32.mrb[3].mxu1  ;;  %v1374_v23 = vmax.f32 %v1126_v17, 0.0 }
 0x1d3   : > { %v1121_v22 = vadd.f32 %v2598_v15, %v1120_v21  ;;  %v1372_v25 = vmax.f32 %v1118_v19, 0.0 }
 0x1d4   : > { %v1375_v24 = vmax.f32 %v1129_v43, 0.0 }
 0x1d5   : > { %v1373_v26 = vmax.f32 %v1121_v22, 0.0 }
 0x1d6   : > { %v2604_v27 = vpack.c.bf16 %v1375_v24, %v1374_v23 }
 0x1d7   : > { %v2606_v28 = vpack.c.bf16 %v1373_v26, %v1372_v25  ;;  %v2046_v29 = vpop.f32.mrb[4].mxu1 }
 0x1d8   : > { %v1142_v30 = vadd.f32 %v2046_v29, %v2598_v15  ;;  %v1133_v31 = vpop.f32.mrb[5].mxu1 }
 0x1d9   : > { %v1134_v32 = vadd.f32 %v2598_v15, %v1133_v31  ;;  %v2047_v33 = vpop.f32.mrb[6].mxu1 }
 0x1da   : > { %v1145_v34 = vadd.f32 %v2047_v33, %v2598_v15  ;;  %v1136_v35 = vpop.f32.mrb[7].mxu1  ;;  %v1378_v37 = vmax.f32 %v1142_v30, 0.0  ;;  %v1437_v30 = vld [vmem:[#allocation2] sm:$0x1]  ;;  %v2332_v33 = vmov 0  }
 0x1db   : > { %v1137_v36 = vadd.f32 %v2598_v15, %v1136_v35  ;;  %v1376_v39 = vmax.f32 %v1134_v32, 0.0  ;;  %2209 = vset.pattern.permute.xlu0 %v2332_v33 }
 0x1dc   : > { %v1379_v38 = vmax.f32 %v1145_v34, 0.0  ;;  %1440 = vperm.xlu0 %2209, %v1437_v30  }
 0x1dd   : > { %v1377_v40 = vmax.f32 %v1137_v36, 0.0 }
 0x1de   : > { %v2612_v41 = vpack.c.bf16 %v1379_v38, %v1378_v37 }
 0x1df   : > { %v2614_v42 = vpack.c.bf16 %v1377_v40, %v1376_v39  ;;  %v2050_v44 = vpop.f32.mrb[8].mxu1 }
 0x1e0   : > { %v1158_v45 = vadd.f32 %v2050_v44, %v2598_v15  ;;  %v1149_v46 = vpop.f32.mrb[9].mxu1 }
 0x1e1   : > { %v1150_v47 = vadd.f32 %v2598_v15, %v1149_v46  ;;  %v2051_v48 = vpop.f32.mrb[10].mxu1 }
 0x1e2   : > { %v1161_v49 = vadd.f32 %v2051_v48, %v2598_v15  ;;  %v1152_v50 = vpop.f32.mrb[11].mxu1  ;;  %v1382_v52 = vmax.f32 %v1158_v45, 0.0 }
 0x1e3   : > { %v1153_v51 = vadd.f32 %v2598_v15, %v1152_v50  ;;  %v1380_v54 = vmax.f32 %v1150_v47, 0.0 }
 0x1e4   : > { %v1383_v53 = vmax.f32 %v1161_v49, 0.0 }
 0x1e5   : > { %v1381_v55 = vmax.f32 %v1153_v51, 0.0 }
 0x1e6   : > { %v2620_v56 = vpack.c.bf16 %v1383_v53, %v1382_v52 }
 0x1e7   : > { %v2622_v57 = vpack.c.bf16 %v1381_v55, %v1380_v54  ;;  %v2054_v58 = vpop.f32.mrb[12].mxu1 }
 0x1e8   : > { %v1174_v59 = vadd.f32 %v2054_v58, %v2598_v15  ;;  %v1165_v60 = vpop.f32.mrb[13].mxu1 }
 0x1e9   : > { %v1166_v61 = vadd.f32 %v2598_v15, %v1165_v60  ;;  %v2055_v62 = vpop.f32.mrb[14].mxu1 }
 0x1ea   : > { %v1177_v63 = vadd.f32 %v2055_v62, %v2598_v15  ;;  %v1168_v0 = vpop.f32.mrb[15].mxu1  ;;  %v1386_v2 = vmax.f32 %v1174_v59, 0.0 }
 0x1eb   : > { %v1169_v1 = vadd.f32 %v2598_v15, %v1168_v0  ;;  %v1384_v4 = vmax.f32 %v1166_v61, 0.0 }
 0x1ec   : > { %v1387_v3 = vmax.f32 %v1177_v63, 0.0 }
 0x1ed   : > { %v1385_v5 = vmax.f32 %v1169_v1, 0.0 }
 0x1ee   : > { %v2628_v6 = vpack.c.bf16 %v1387_v3, %v1386_v2 }
 0x1ef   : > { %v2630_v7 = vpack.c.bf16 %v1385_v5, %v1384_v4  ;;  %v2058_v8 = vpop.f32.mrb[16].mxu1 }
 0x1f0   : > { %v1190_v9 = vadd.f32 %v2058_v8, %v2598_v15  ;;  %v1181_v10 = vpop.f32.mrb[17].mxu1 }
 0x1f1   : > { %v1182_v11 = vadd.f32 %v2598_v15, %v1181_v10  ;;  %v2059_v12 = vpop.f32.mrb[18].mxu1 }
 0x1f2   : > { %v1193_v13 = vadd.f32 %v2059_v12, %v2598_v15  ;;  %v1184_v14 = vpop.f32.mrb[19].mxu1  ;;  %v1390_v18 = vmax.f32 %v1190_v9, 0.0 }
 0x1f3   : > { %v1185_v17 = vadd.f32 %v2598_v15, %v1184_v14  ;;  %v1388_v20 = vmax.f32 %v1182_v11, 0.0 }
 0x1f4   : > { %v1391_v19 = vmax.f32 %v1193_v13, 0.0 }
 0x1f5   : > { %v1389_v43 = vmax.f32 %v1185_v17, 0.0 }
 0x1f6   : > { %v2108_v21 = vpack.c.bf16 %v1391_v19, %v1390_v18 }
 0x1f7   : > { %v2104_v22 = vpack.c.bf16 %v1389_v43, %v1388_v20  ;;  %v2062_v23 = vpop.f32.mrb[20].mxu1 }
 0x1f8   : > { %v1206_v24 = vadd.f32 %v2062_v23, %v2598_v15  ;;  %v1197_v25 = vpop.f32.mrb[21].mxu1 }
 0x1f9   : > { %v1198_v26 = vadd.f32 %v2598_v15, %v1197_v25  ;;  %v2063_v29 = vpop.f32.mrb[22].mxu1  ;;  %2105 = vmatprep.subr.bf16.mxu0 %v2104_v22 }
 0x1fa   : > { %v1209_v31 = vadd.f32 %v2063_v29, %v2598_v15  ;;  %v1200_v32 = vpop.f32.mrb[23].mxu1  ;;  %2107 = vmatpush3.bf16.xpose.msra.mxu0 %v2606_v28  ;;  %v1394_v35 = vmax.f32 %v1206_v24, 0.0 }
 0x1fb   : > { %v1201_v34 = vadd.f32 %v2598_v15, %v1200_v32  ;;  %2109 = vmatprep.subr.bf16.mxu0 %v2108_v21  ;;  %v1392_v37 = vmax.f32 %v1198_v26, 0.0 }
 0x1fc   : > { %v1395_v36 = vmax.f32 %v1209_v31, 0.0 }
 0x1fd   : > { %v1393_v38 = vmax.f32 %v1201_v34, 0.0 }
 0x1fe   : > { %v2116_v39 = vpack.c.bf16 %v1395_v36, %v1394_v35 }
 0x1ff   : > { %v2112_v40 = vpack.c.bf16 %v1393_v38, %v1392_v37  ;;  %v2066_v44 = vpop.f32.mrb[24].mxu1 }
 0x200   : > { %v1222_v45 = vadd.f32 %v2066_v44, %v2598_v15  ;;  %v1213_v46 = vpop.f32.mrb[25].mxu1 }
 0x201   : > { %v1214_v47 = vadd.f32 %v2598_v15, %v1213_v46  ;;  %v2067_v48 = vpop.f32.mrb[26].mxu1 }
 0x202   : > { %v1225_v28 = vadd.f32 %v2067_v48, %v2598_v15  ;;  %v1216_v49 = vpop.f32.mrb[27].mxu1  ;;  %2111 = vmatpush3.bf16.xpose.msra.mxu0 %v2604_v27  ;;  %v1398_v51 = vmax.f32 %v1222_v45, 0.0 }
 0x203   : > { %v1217_v50 = vadd.f32 %v2598_v15, %v1216_v49  ;;  %2113 = vmatprep.subr.bf16.mxu0 %v2112_v40  ;;  %v1396_v53 = vmax.f32 %v1214_v47, 0.0 }
 0x204   : > { %v1399_v52 = vmax.f32 %v1225_v28, 0.0 }
 0x205   : > { %v1397_v54 = vmax.f32 %v1217_v50, 0.0 }
 0x206   : > { %v2124_v55 = vpack.c.bf16 %v1399_v52, %v1398_v51 }
 0x207   : > { %v2120_v58 = vpack.c.bf16 %v1397_v54, %v1396_v53  ;;  %v2070_v59 = vpop.f32.mrb[28].mxu1 }
 0x208   : > { %v1238_v60 = vadd.f32 %v2070_v59, %v2598_v15  ;;  %v1229_v61 = vpop.f32.mrb[29].mxu1 }
 0x209   : > { %v1230_v62 = vadd.f32 %v2598_v15, %v1229_v61  ;;  %v2071_v63 = vpop.f32.mrb[30].mxu1 }
 0x20a   : > { %v1241_v0 = vadd.f32 %v2071_v63, %v2598_v15  ;;  %v1232_v1 = vpop.f32.mrb[31].mxu1  ;;  %2115 = vmatpush3.bf16.xpose.msra.mxu0 %v2614_v42  ;;  %v1402_v2 = vmax.f32 %v1238_v60, 0.0 }
 0x20b   : > { %v1233_v27 = vadd.f32 %v2598_v15, %v1232_v1  ;;  %2117 = vmatprep.subr.bf16.mxu0 %v2116_v39  ;;  %v1400_v4 = vmax.f32 %v1230_v62, 0.0 }
 0x20c   : > { %v1403_v3 = vmax.f32 %v1241_v0, 0.0 }
 0x20d   : > { %v1401_v5 = vmax.f32 %v1233_v27, 0.0 }
 0x20e   : > { %v2132_v8 = vpack.c.bf16 %v1403_v3, %v1402_v2 }
 0x20f   : > { %v2128_v9 = vpack.c.bf16 %v1401_v5, %v1400_v4  ;;  %v2074_v10 = vpop.f32.mrb[32].mxu1 }
 0x210   : > { %v1254_v11 = vadd.f32 %v2074_v10, %v2598_v15  ;;  %v1245_v12 = vpop.f32.mrb[33].mxu1 }
 0x211   : > { %v1246_v13 = vadd.f32 %v2598_v15, %v1245_v12  ;;  %v2075_v14 = vpop.f32.mrb[34].mxu1 }
 0x212   : > { %v1257_v17 = vadd.f32 %v2075_v14, %v2598_v15  ;;  %v1248_v18 = vpop.f32.mrb[35].mxu1  ;;  %2119 = vmatpush3.bf16.xpose.msra.mxu0 %v2612_v41  ;;  %v1406_v19 = vmax.f32 %v1254_v11, 0.0 }
 0x213   : > { %v1249_v42 = vadd.f32 %v2598_v15, %v1248_v18  ;;  %2121 = vmatprep.subr.bf16.mxu0 %v2120_v58  ;;  %v1404_v43 = vmax.f32 %v1246_v13, 0.0 }
 0x214   : > { %v1407_v20 = vmax.f32 %v1257_v17, 0.0 }
 0x215   : > { %v1405_v21 = vmax.f32 %v1249_v42, 0.0 }
 0x216   : > { %v2663_v22 = vpack.c.bf16 %v1407_v20, %v1406_v19 }
 0x217   : > { %v2665_v23 = vpack.c.bf16 %v1405_v21, %v1404_v43  ;;  %v2078_v24 = vpop.f32.mrb[36].mxu1 }
 0x218   : > { %v1270_v25 = vadd.f32 %v2078_v24, %v2598_v15  ;;  %v1261_v26 = vpop.f32.mrb[37].mxu1 }
 0x219   : > { %v1262_v29 = vadd.f32 %v2598_v15, %v1261_v26  ;;  %v2079_v30 = vpop.f32.mrb[38].mxu1 }
 0x21a   : > { %v1273_v41 = vadd.f32 %v2079_v30, %v2598_v15  ;;  %v1264_v31 = vpop.f32.mrb[39].mxu1  ;;  %2123 = vmatpush3.bf16.xpose.msra.mxu0 %v2622_v57  ;;  %v1410_v33 = vmax.f32 %v1270_v25, 0.0 }
 0x21b   : > { %v1265_v32 = vadd.f32 %v2598_v15, %v1264_v31  ;;  %2125 = vmatprep.subr.bf16.mxu0 %v2124_v55  ;;  %v1408_v35 = vmax.f32 %v1262_v29, 0.0 }
 0x21c   : > { %v1411_v34 = vmax.f32 %v1273_v41, 0.0 }
 0x21d   : > { %v1409_v36 = vmax.f32 %v1265_v32, 0.0 }
 0x21e   : > { %v2672_v37 = vpack.c.bf16 %v1411_v34, %v1410_v33 }
 0x21f   : > { %v2674_v38 = vpack.c.bf16 %v1409_v36, %v1408_v35  ;;  %v2082_v39 = vpop.f32.mrb[40].mxu1 }
 0x220   : > { %v1286_v40 = vadd.f32 %v2082_v39, %v2598_v15  ;;  %v1277_v44 = vpop.f32.mrb[41].mxu1 }
 0x221   : > { %v1278_v45 = vadd.f32 %v2598_v15, %v1277_v44  ;;  %v2083_v46 = vpop.f32.mrb[42].mxu1 }
 0x222   : > { %v1289_v57 = vadd.f32 %v2083_v46, %v2598_v15  ;;  %v1280_v47 = vpop.f32.mrb[43].mxu1  ;;  %2127 = vmatpush3.bf16.xpose.msra.mxu0 %v2620_v56  ;;  %v1414_v28 = vmax.f32 %v1286_v40, 0.0 }
 0x223   : > { %v1281_v48 = vadd.f32 %v2598_v15, %v1280_v47  ;;  %2129 = vmatprep.subr.bf16.mxu0 %v2128_v9  ;;  %v1412_v50 = vmax.f32 %v1278_v45, 0.0 }
 0x224   : > { %v1415_v49 = vmax.f32 %v1289_v57, 0.0 }
 0x225   : > { %v1413_v51 = vmax.f32 %v1281_v48, 0.0 }
 0x226   : > { %v2681_v52 = vpack.c.bf16 %v1415_v49, %v1414_v28 }
 0x227   : > { %v2683_v53 = vpack.c.bf16 %v1413_v51, %v1412_v50  ;;  %v2086_v54 = vpop.f32.mrb[44].mxu1 }
 0x228   : > { %v1302_v55 = vadd.f32 %v2086_v54, %v2598_v15  ;;  %v1293_v58 = vpop.f32.mrb[45].mxu1 }
 0x229   : > { %v1294_v59 = vadd.f32 %v2598_v15, %v1293_v58  ;;  %v2087_v60 = vpop.f32.mrb[46].mxu1 }
 0x22a   : > { %v1305_v56 = vadd.f32 %v2087_v60, %v2598_v15  ;;  %v1296_v61 = vpop.f32.mrb[47].mxu1  ;;  %2131 = vmatpush3.bf16.xpose.msra.mxu0 %v2630_v7  ;;  %v1418_v63 = vmax.f32 %v1302_v55, 0.0 }
 0x22b   : > { %v1297_v62 = vadd.f32 %v2598_v15, %v1296_v61  ;;  %2133 = vmatprep.subr.bf16.mxu0 %v2132_v8  ;;  %v1416_v1 = vmax.f32 %v1294_v59, 0.0 }
 0x22c   : > { %v1419_v0 = vmax.f32 %v1305_v56, 0.0 }
 0x22d   : > { %v1417_v27 = vmax.f32 %v1297_v62, 0.0 }
 0x22e   : > { %v2690_v2 = vpack.c.bf16 %v1419_v0, %v1418_v63 }
 0x22f   : > { %v2692_v3 = vpack.c.bf16 %v1417_v27, %v1416_v1  ;;  %v2090_v4 = vpop.f32.mrb[48].mxu1 }
 0x230   : > { %v1318_v5 = vadd.f32 %v2090_v4, %v2598_v15  ;;  %v1309_v9 = vpop.f32.mrb[49].mxu1 }
 0x231   : > { %v1310_v10 = vadd.f32 %v2598_v15, %v1309_v9  ;;  %v2091_v11 = vpop.f32.mrb[50].mxu1 }
 0x232   : > { %v1321_v7 = vadd.f32 %v2091_v11, %v2598_v15  ;;  %v1312_v12 = vpop.f32.mrb[51].mxu1  ;;  %2135 = vmatpush3.bf16.xpose.msra.mxu0 %v2628_v6  ;;  %v1422_v13 = vmax.f32 %v1318_v5, 0.0 }
 0x233   : > { %v1313_v8 = vadd.f32 %v2598_v15, %v1312_v12  ;;  %v1420_v17 = vmax.f32 %v1310_v10, 0.0 }
 0x234   : > { %v1423_v14 = vmax.f32 %v1321_v7, 0.0 }
 0x235   : > { %v1421_v18 = vmax.f32 %v1313_v8, 0.0 }
 0x236   : > { %v2140_v42 = vpack.c.bf16 %v1423_v14, %v1422_v13 }
 0x237   : > { %v2136_v19 = vpack.c.bf16 %v1421_v18, %v1420_v17  ;;  %v2094_v20 = vpop.f32.mrb[52].mxu1 }
 0x238   : > { %v1334_v43 = vadd.f32 %v2094_v20, %v2598_v15  ;;  %v1325_v21 = vpop.f32.mrb[53].mxu1 }
 0x239   : > { %2137 = vmatprep.subr.bf16.mxu1 %v2136_v19  ;;  %v1326_v24 = vadd.f32 %v2598_v15, %v1325_v21  ;;  %v2095_v25 = vpop.f32.mrb[54].mxu1  ;;  %1921 = vmatmul.mubr.f32.vlgmr.msra.gmra.mrb[64].mxu0 %v2638_v16 }
 0x23a   : > { %2139 = vmatpush3.bf16.xpose.msra.mxu1 %v2665_v23  ;;  %v1426_v6 = vmax.f32 %v1334_v43, 0.0  ;;  %v1337_v26 = vadd.f32 %v2095_v25, %v2598_v15  ;;  %v1328_v29 = vpop.f32.mrb[55].mxu1 }
 0x23b   : > { %2141 = vmatprep.subr.bf16.mxu1 %v2140_v42  ;;  %v1424_v30 = vmax.f32 %v1326_v24, 0.0  ;;  %v1329_v41 = vadd.f32 %v2598_v15, %v1328_v29 }
 0x23c   : > { %v1427_v31 = vmax.f32 %v1337_v26, 0.0  ;;  %v2333_v26 = vmov 1966171168  }
 0x23d   : > { %v1425_v32 = vmax.f32 %v1329_v41, 0.0  ;;  %v1620_v29 = vunpack.c.l.s4 %v2333_v26 }
 0x23e   : > { %v2148_v33 = vpack.c.bf16 %v1427_v31, %v1426_v6 }
 0x23f   : > { %v2144_v34 = vpack.c.bf16 %v1425_v32, %v1424_v30  ;;  %v2098_v35 = vpop.f32.mrb[56].mxu1  ;;  %v1621_v30 = vunpack.c.0.s8 %v1620_v29 }
 0x240   : > { %v1350_v36 = vadd.f32 %v2098_v35, %v2598_v15  ;;  %v1341_v39 = vpop.f32.mrb[57].mxu1 }
 0x241   : > { %v1342_v40 = vadd.f32 %v2598_v15, %v1341_v39  ;;  %v2099_v44 = vpop.f32.mrb[58].mxu1 }
 0x242   : > { %2143 = vmatpush3.bf16.xpose.msra.mxu1 %v2663_v22  ;;  %v1430_v23 = vmax.f32 %v1350_v36, 0.0  ;;  %v1353_v45 = vadd.f32 %v2099_v44, %v2598_v15  ;;  %v1344_v46 = vpop.f32.mrb[59].mxu1 }
 0x243   : > { %2145 = vmatprep.subr.bf16.mxu1 %v2144_v34  ;;  %v1428_v57 = vmax.f32 %v1342_v40, 0.0  ;;  %v1345_v47 = vadd.f32 %v2598_v15, %v1344_v46 }
 0x244   : > { %v1431_v48 = vmax.f32 %v1353_v45, 0.0 }
 0x245   : > { %v1429_v28 = vmax.f32 %v1345_v47, 0.0 }
 0x246   : > { %v2156_v49 = vpack.c.bf16 %v1431_v48, %v1430_v23 }
 0x247   : > { %v2152_v50 = vpack.c.bf16 %v1429_v28, %v1428_v57  ;;  %v2102_v51 = vpop.f32.mrb[60].mxu1 }
 0x248   : > { %v1366_v54 = vadd.f32 %v2102_v51, %v2598_v15  ;;  %v1357_v55 = vpop.f32.mrb[61].mxu1 }
 0x249   : > { %v1358_v58 = vadd.f32 %v2598_v15, %v1357_v55  ;;  %v2103_v59 = vpop.f32.mrb[62].mxu1 }
 0x24a   : > { %2147 = vmatpush3.bf16.xpose.msra.mxu1 %v2674_v38  ;;  %v1434_v22 = vmax.f32 %v1366_v54, 0.0  ;;  %v1369_v60 = vadd.f32 %v2103_v59, %v2598_v15  ;;  %v1360_v56 = vpop.f32.mrb[63].mxu1 }
 0x24b   : > { %2149 = vmatprep.subr.bf16.mxu1 %v2148_v33  ;;  %v1432_v61 = vmax.f32 %v1358_v58, 0.0  ;;  %v1361_v62 = vadd.f32 %v2598_v15, %v1360_v56  ;;  %v1443_v15 = vlaneseq }
 0x24c   : > { %v1435_v63 = vmax.f32 %v1369_v60, 0.0 }
 0x24d   : > { %v1433_v0 = vmax.f32 %v1361_v62, 0.0  ;;  %v1444_v38 = vshrl.u32 %v1443_v15, 7  ;;  %vm1644_vm1 = vcmp.lt.s32.totalorder %v1443_v15, 512 }
 0x24e   : > { %v2164_v1 = vpack.c.bf16 %v1435_v63, %v1434_v22 }
 0x24f   : > { %v2160_v27 = vpack.c.bf16 %v1433_v0, %v1432_v61  ;;  %v1445_v4 = vsub.s32 0, %v1444_v38  ;;  %v1624_v41 = vsub.s32 %v1621_v30, %v1444_v38 }
 0x252   : > { %2151 = vmatpush3.bf16.xpose.msra.mxu1 %v2672_v37 }
 0x253   : > { %2153 = vmatprep.subr.bf16.mxu1 %v2152_v50 }
 0x25a   : > { %2155 = vmatpush3.bf16.xpose.msra.mxu1 %v2683_v53 }
 0x25b   : > { %2157 = vmatprep.subr.bf16.mxu1 %v2156_v49  ;;  %v1441_v5 = vpop.permute.xlu0 %1440 }
 0x25c   : > { %v1446_v9 = vrot.slane %v1441_v5, %v1445_v4 }
 0x262   : > { %2159 = vmatpush3.bf16.xpose.msra.mxu1 %v2681_v52 }
 0x263   : > { %2161 = vmatprep.subr.bf16.mxu1 %v2160_v27 }
 0x26a   : > { %2163 = vmatpush3.bf16.xpose.msra.mxu1 %v2692_v3 }
 0x26b   : > { %2165 = vmatprep.subr.bf16.mxu1 %v2164_v1 }
 0x272   : > { %2167 = vmatpush3.bf16.xpose.msra.mxu1 %v2690_v2 }
 0x279   : > { %1955 = vmatmul.mubr.f32.vlgmr.msra.gmra.mrb[64].mxu1 %v2638_v16 }
 0x30c   : > { %v1513_v37 = vpop.f32.mrb[64].mxu0 }
 0x30d   : > { %v1514_v10 = vadd.f32 %v1513_v37, %v1446_v9  ;;  %v1515_v11 = vpop.f32.mrb[65].mxu0 }
 0x30e   : > { %v1516_v53 = vadd.f32 %v1515_v11, %v1446_v9 }
 0x30f   : > { %v1804_v7 = vmul.f32 -1.442695, %v1514_v10 }
 0x310   : > { %v1805_v12 = vmul.f32 -1.442695, %v1516_v53 }
 0x311   : > { %2252 = vpow2.f32 %v1804_v7 }
 0x312   : > { %2254 = vpow2.f32 %v1805_v12 }
 0x31b   : > { %v2253_v52 = vpop.eup %2252 }
 0x31c   : > { %v2255_v3 = vpop.eup %2254  ;;  %v1601_v8 = vadd.f32 1.0, %v2253_v52 }
 0x31d   : > { %v1602_v13 = vadd.f32 1.0, %v2255_v3 }
 0x31e   : > { %2256 = vrcp.f32 %v1601_v8 }
 0x31f   : > { %2258 = vrcp.f32 %v1602_v13 }
 0x328   : > { %v2257_v16 = vpop.eup %2256 }
 0x329   : > { %v2259_v2 = vpop.eup %2258 }
 0x32a   : > { %v1617_v14 = vcombine.low %v2257_v16, %v2259_v2 }
 0x32c   : > { %v1625_v34 = vrot.slane %v1617_v14, %v1624_v41 }
 0x34c   : > { %v1584_v17 = vpop.f32.mrb[64].mxu1 }
 0x34d   : > { %v1585_v18 = vadd.f32 %v1584_v17, %v1446_v9  ;;  %v1586_v42 = vpop.f32.mrb[65].mxu1 }
 0x34e   : > { %v1587_v19 = vadd.f32 %v1586_v42, %v1446_v9 }
 0x34f   : > { %v1806_v20 = vmul.f32 -1.442695, %v1585_v18 }
 0x350   : > { %v1807_v43 = vmul.f32 -1.442695, %v1587_v19 }
 0x351   : > { %2260 = vpow2.f32 %v1806_v20 }
 0x352   : > { %2262 = vpow2.f32 %v1807_v43 }
 0x35b   : > { %v2261_v21 = vpop.eup %2260 }
 0x35c   : > { %v2263_v24 = vpop.eup %2262  ;;  %v1603_v25 = vadd.f32 1.0, %v2261_v21 }
 0x35d   : > { %v1604_v6 = vadd.f32 1.0, %v2263_v24 }
 0x35e   : > { %2264 = vrcp.f32 %v1603_v25 }
 0x35f   : > { %2266 = vrcp.f32 %v1604_v6 }
 0x368   : > { %v2265_v31 = vpop.eup %2264 }
 0x369   : > { %v2267_v32 = vpop.eup %2266 }
 0x36a   : > { %v1618_v33 = vcombine.low %v2265_v31, %v2267_v32 }
 0x36c   : > { %v1632_v35 = vrot.slane %v1618_v33, %v1624_v41 }
 0x36e   : > { %v1633_v36 = vcombine.low %v1625_v34, %v1632_v35 }
 0x370   : > { %v1640_v39 = vrot.slane %v1633_v36, %v1624_v41 }
 0x372   : > { %1646 = vst.msk [vmem:[%s274_s18] sm:$0xf] %vm1644_vm1, %v1640_v39 }
 0x373   : > { %2281 = shalt.err (!%p2278_p3)
}
 0x374   : > { %s2282_s16 = scalar_lea.hbm %s2726_s22, 64  ;;  %s2286_s14 = scalar_lea.hbm %s2775_s7, 128 }
 0x375   : > { %p2283_p4 = scmp.ne.s32.totalorder %s2726_s22, %s2282_s16  ;;  %p2287_p9 = scmp.lt.u32.totalorder %s2726_s22, %s2775_s7 }
 0x376   : > { %p2288_p10 = scmp.lt.u32.totalorder %s2286_s14, %s2282_s16  ;;  %p2290_p12 = scmp.lt.u32.totalorder %s2282_s16, %s2726_s22 }
 0x377   : > { %p2284_p7 = pnand %p2283_p4, %p2413_p5 }
 0x378   : > { %p2289_p11 = por %p2288_p10, %p2287_p9 }
 0x379   : > { %p2285_p8 = pneg %p2284_p7 }
 0x37a   : > { %p2291_p13 = por %p2290_p12, %p2289_p11 }
 0x37c   : > { %p2292_p0 = pnand %p2291_p13, %p2285_p8 }
 0x37e   : > { %2295 = shalt.err (!%p2292_p0)
}
 0x37f   : > { %2168 = dma.vmem_to_hbm [thread:$0]  (%p2413_p5), %s2728_s19, 64, %s2726_s22, %s1648_s23  }
 0x380 PF: > { %p2174_p1 = scmp.ge.s32.totalorder %s2330_s29, 2  ;;  %s1674_s18 = sand.u32 1, %s2318_s26  }
 0x381   : > { %s1675_s20 = scalar_lea.sflag [#allocation4], %s1674_s18 }
 0x382   : > { %p2171_p2 = pnand %p2174_p1, %p2417_p6 }
 0x384   : > { %2313 = dma.done.wait (!%p2171_p2), %s1675_s20, 64  }
 0x385   : > { %2315 = vsyncadd (!%p2171_p2), %s1675_s20, 4294967232  ;;  %p19_p3 = scmp.ge.s32.totalorder %s2401_s8, 4   ;;  %s2778_s26 = smov %s2322_s27 }
 0x386   : > { %s2779_s27 = smov %s2326_s28  ;;  %s2780_s28 = smov %s2411_s11 }
 0x387   : > { %s2781_s29 = smov %s2401_s8  ;;  %21 = sbr.rel (!%p19_p3) target bundleno = 6 (0x6), region = 83 }
 0x38e   :  { %1680 = vsyncpa [#allocation4], 1 }
 0x38f   :  { %1682 = vsyncpa [#allocation4 + $0x1], 1 }

</bundles_post_ra>
